<compile_context>
chip_gen: v7x
topology: tpu7x:2x2x1
jax: 0.10.0
libtpu: 0.0.40
codegen_flags: <defaults>
</compile_context>

<pallas_src>
import jax
import jax.numpy as jnp
from jax.experimental import pallas as pl
from jax.experimental.pallas import tpu as pltpu

HIDDEN_SIZES = [128, 32, 8]
INPUT_SIZE = 2
OUTPUT_SIZE = 1
SIGNAL_SCALE = 1000000.0

TILE_B_MAX = 2048   # batch tile on the lane axis (multiple of CHUNK_B)
CHUNK_B = 512       # in-kernel lane-chunk: bounds live (128, chunk) intermediate


def _round_up(x, m):
    return ((x + m - 1) // m) * m


def _make_kernel(chunk, n_chunks):
    """Kernel factory: chunk/n_chunks are static (tile_b = chunk * n_chunks)."""

    def kernel(x_ref, w1_ref, b1_ref, w2_ref, b2_ref, w3_ref, b3_ref,
               w4_ref, b4_ref, out_ref):
        # Tiny weights/biases: load once per grid step (VMEM-resident blocks).
        w1 = w1_ref[...]   # (128, 2)  SIGNAL_SCALE folded into column 0
        b1 = b1_ref[...]   # (128, 1)
        w2 = w2_ref[...]   # (32, 128)
        b2 = b2_ref[...]   # (32, 1)
        w3 = w3_ref[...]   # (8, 32)
        b3 = b3_ref[...]   # (8, 1)
        w4 = w4_ref[...]   # (8, 1)
        b4 = b4_ref[...]   # (1, 1)

        # Statically-unrolled lane-chunk loop (n_chunks <= 4); static ref slices
        # are zero-cost views and bound the live intermediate to (128, chunk).
        for c in range(n_chunks):
            lo = c * chunk
            x = x_ref[:, lo:lo + chunk]                                   # (2, chunk)

            # Layer 1 on the MXU: (128,2) @ (2,chunk) -> (128,chunk).
            h = jnp.dot(w1, x, preferred_element_type=jnp.float32) + b1
            h = jnp.maximum(h, 0.0)

            # Layer 2: (32,128) @ (128,chunk).
            h = jnp.dot(w2, h, preferred_element_type=jnp.float32) + b2
            h = jnp.maximum(h, 0.0)

            # Layer 3: (8,32) @ (32,chunk).
            h = jnp.dot(w3, h, preferred_element_type=jnp.float32) + b3
            h = jnp.maximum(h, 0.0)

            # Layer 4 (8 -> 1): cheap broadcast-multiply + sublane reduce.
            out_ref[:, lo:lo + chunk] = (
                jnp.sum(w4 * h, axis=0, keepdims=True) + b4)              # (1, chunk)

    return kernel


def init_params(key):
    """Deterministic init mimicking torch.nn.Linear defaults (U(-k, k), k=1/sqrt(fan_in))."""
    dims = [INPUT_SIZE] + HIDDEN_SIZES + [OUTPUT_SIZE]
    params = []
    for i in range(len(dims) - 1):
        fan_in, fan_out = dims[i], dims[i + 1]
        key, kw, kb = jax.random.split(key, 3)
        k = 1.0 / jnp.sqrt(jnp.float32(fan_in))
        w = jax.random.uniform(kw, (fan_in, fan_out), jnp.float32, -k, k)
        b = jax.random.uniform(kb, (fan_out,), jnp.float32, -k, k)
        params.append((w, b))
    return params


def _prep_params(params):
    """Repack params for the batch-on-lanes layout (weights as (out, in) columns)."""
    (w1, b1), (w2, b2), (w3, b3), (w4, b4) = params
    h1, h2, h3 = HIDDEN_SIZES
    scale = jnp.array([[SIGNAL_SCALE], [1.0]], jnp.float32)         # fold scale into fn_1 column
    w1p = (w1.astype(jnp.float32) * scale).T                        # (128, 2)
    b1c = b1.reshape(h1, 1).astype(jnp.float32)                     # (128, 1)
    w2t = w2.T.astype(jnp.float32)                                  # (32, 128)
    b2c = b2.reshape(h2, 1).astype(jnp.float32)                     # (32, 1)
    w3t = w3.T.astype(jnp.float32)                                  # (8, 32)
    b3c = b3.reshape(h3, 1).astype(jnp.float32)                     # (8, 1)
    w4c = w4.astype(jnp.float32)                                    # (8, 1)
    b4c = b4.reshape(1, 1).astype(jnp.float32)                      # (1, 1)
    return w1p, b1c, w2t, b2c, w3t, b3c, w4c, b4c


@jax.jit
def net_simple_forward(fn_1, j0_n_1, params):
    """Equivalent of NetSimple.forward(fn_1, J0_n_1) -> shape (B,)."""
    B = fn_1.shape[0]

    # Tile sizing: split the batch in two (so v7x's 2 TensorCores both get work),
    # round to lanes; large batches get TILE_B_MAX tiles made of CHUNK_B chunks.
    half = _round_up(-(-B // 2), 128)
    if half <= CHUNK_B:
        tile_b = half
    else:
        tile_b = min(TILE_B_MAX, _round_up(half, CHUNK_B))
    b_pad = _round_up(B, tile_b)
    num_tiles = b_pad // tile_b
    chunk = min(CHUNK_B, tile_b)
    n_chunks = tile_b // chunk

    # True-sized input slab: (2, b_pad), rows = [fn_1, J0_n_1] (scale folded into w1).
    x = jnp.stack((fn_1.astype(jnp.float32), j0_n_1.astype(jnp.float32)), axis=0)
    x = jnp.pad(x, ((0, 0), (0, b_pad - B)))

    w1p, b1c, w2t, b2c, w3t, b3c, w4c, b4c = _prep_params(params)
    consts = (w1p, b1c, w2t, b2c, w3t, b3c, w4c, b4c)

    out = pl.pallas_call(
        _make_kernel(chunk, n_chunks),
        out_shape=jax.ShapeDtypeStruct((1, b_pad), jnp.float32),
        grid=(num_tiles,),
        in_specs=[pl.BlockSpec((2, tile_b), lambda i: (0, i))] +
                 # Constant block index -> weights/biases stay VMEM-resident.
                 [pl.BlockSpec(a.shape, lambda i: (0, 0)) for a in consts],
        out_specs=pl.BlockSpec((1, tile_b), lambda i: (0, i)),
        compiler_params=pltpu.CompilerParams(
            dimension_semantics=("parallel",)),   # shard batch tiles across v7x's 2 TCs
    )(x, *consts)

    # Row 0 holds the output (lane-dense read); trim batch padding.
    return out[0, :B]


def _reference_forward(fn_1, j0_n_1, params):
    """Plain-JAX reference at HIGHEST matmul precision (ground truth)."""
    x = jnp.stack((fn_1 * SIGNAL_SCALE, j0_n_1), axis=1)
    for i, (w, b) in enumerate(params):
        x = jnp.dot(x, w, precision=jax.lax.Precision.HIGHEST) + b
        if i < len(params) - 1:
            x = jnp.maximum(x, 0.0)
    return jnp.squeeze(x, axis=-1)


if __name__ == "__main__":
    key = jax.random.PRNGKey(0)
    kp, k1, k2, k3, k4 = jax.random.split(key, 5)
    params = init_params(kp)

    # Tolerance covers TPU matmul pass-decomposition differences between the
    # kernel and the reference; real bugs show up as O(0.1+) errors.
    RTOL = ATOL = 5e-3

    # Small case (B=8): single grid tile, single in-kernel chunk.
    B = 8
    fn_1 = jax.random.uniform(k1, (B,), jnp.float32, -1e-6, 1e-6)
    j0_n_1 = jax.random.uniform(k2, (B,), jnp.float32, -1.0, 1.0)
    qn = jax.block_until_ready(net_simple_forward(fn_1, j0_n_1, params))
    ref = _reference_forward(fn_1, j0_n_1, params)
    assert qn.shape == (B,)
    assert jnp.allclose(qn, ref, rtol=RTOL, atol=ATOL), (qn, ref)

    # Larger case: 2 grid tiles (exercises megacore split) x 3 lane-chunks each,
    # plus batch-padding trim.
    B2 = 2500
    fn_1b = jax.random.uniform(k3, (B2,), jnp.float32, -1e-6, 1e-6)
    j0_n_1b = jax.random.uniform(k4, (B2,), jnp.float32, -1.0, 1.0)
    qn2 = jax.block_until_ready(net_simple_forward(fn_1b, j0_n_1b, params))
    ref2 = _reference_forward(fn_1b, j0_n_1b, params)
    assert qn2.shape == (B2,)
    assert jnp.allclose(qn2, ref2, rtol=RTOL, atol=ATOL), (qn2, ref2)

    print("KERNEL_OK")
</pallas_src>

<mosaic_0001>
module attributes {stable_mosaic.version = 11 : i64} {
  func.func @kernel(%arg0: i32, %arg1: memref<2x128xf32, #tpu.memory_space<vmem>>, %arg2: memref<128x2xf32, #tpu.memory_space<vmem>>, %arg3: memref<128x1xf32, #tpu.memory_space<vmem>>, %arg4: memref<32x128xf32, #tpu.memory_space<vmem>>, %arg5: memref<32x1xf32, #tpu.memory_space<vmem>>, %arg6: memref<8x32xf32, #tpu.memory_space<vmem>>, %arg7: memref<8x1xf32, #tpu.memory_space<vmem>>, %arg8: memref<8x1xf32, #tpu.memory_space<vmem>>, %arg9: memref<1x1xf32, #tpu.memory_space<vmem>>, %arg10: memref<1x128xf32, #tpu.memory_space<vmem>>) attributes {dimension_semantics = [#tpu.dimension_semantics<parallel>], iteration_bounds = array<i64: 1>, scalar_prefetch = 0 : i64, scratch_operands = 0 : i64, tpu.core_type = #tpu.core_type<tc>, window_params = [{transform_indices = @transform_0, window_bounds = array<i64: 2, 128>}, {pipeline_mode = #tpu.pipeline_mode<synchronous>, transform_indices = @transform_1, window_bounds = array<i64: 128, 2>}, {pipeline_mode = #tpu.pipeline_mode<synchronous>, transform_indices = @transform_2, window_bounds = array<i64: 128, 1>}, {pipeline_mode = #tpu.pipeline_mode<synchronous>, transform_indices = @transform_3, window_bounds = array<i64: 32, 128>}, {pipeline_mode = #tpu.pipeline_mode<synchronous>, transform_indices = @transform_4, window_bounds = array<i64: 32, 1>}, {pipeline_mode = #tpu.pipeline_mode<synchronous>, transform_indices = @transform_5, window_bounds = array<i64: 8, 32>}, {pipeline_mode = #tpu.pipeline_mode<synchronous>, transform_indices = @transform_6, window_bounds = array<i64: 8, 1>}, {pipeline_mode = #tpu.pipeline_mode<synchronous>, transform_indices = @transform_7, window_bounds = array<i64: 8, 1>}, {pipeline_mode = #tpu.pipeline_mode<synchronous>, transform_indices = @transform_8, window_bounds = array<i64: 1, 1>}, {transform_indices = @transform_9, window_bounds = array<i64: 1, 128>}]} {
    %c0 = arith.constant 0 : index
    %c0_0 = arith.constant 0 : index
    %0 = vector.load %arg2[%c0, %c0_0] : memref<128x2xf32, #tpu.memory_space<vmem>>, vector<128x2xf32>
    %c0_1 = arith.constant 0 : index
    %c0_2 = arith.constant 0 : index
    %1 = vector.load %arg3[%c0_1, %c0_2] : memref<128x1xf32, #tpu.memory_space<vmem>>, vector<128x1xf32>
    %c0_3 = arith.constant 0 : index
    %c0_4 = arith.constant 0 : index
    %2 = vector.load %arg4[%c0_3, %c0_4] : memref<32x128xf32, #tpu.memory_space<vmem>>, vector<32x128xf32>
    %c0_5 = arith.constant 0 : index
    %c0_6 = arith.constant 0 : index
    %3 = vector.load %arg5[%c0_5, %c0_6] : memref<32x1xf32, #tpu.memory_space<vmem>>, vector<32x1xf32>
    %c0_7 = arith.constant 0 : index
    %c0_8 = arith.constant 0 : index
    %4 = vector.load %arg6[%c0_7, %c0_8] : memref<8x32xf32, #tpu.memory_space<vmem>>, vector<8x32xf32>
    %c0_9 = arith.constant 0 : index
    %c0_10 = arith.constant 0 : index
    %5 = vector.load %arg7[%c0_9, %c0_10] : memref<8x1xf32, #tpu.memory_space<vmem>>, vector<8x1xf32>
    %c0_11 = arith.constant 0 : index
    %c0_12 = arith.constant 0 : index
    %6 = vector.load %arg8[%c0_11, %c0_12] : memref<8x1xf32, #tpu.memory_space<vmem>>, vector<8x1xf32>
    %c0_13 = arith.constant 0 : index
    %c0_14 = arith.constant 0 : index
    %7 = vector.load %arg9[%c0_13, %c0_14] : memref<1x1xf32, #tpu.memory_space<vmem>>, vector<1x1xf32>
    %c0_15 = arith.constant 0 : index
    %c0_16 = arith.constant 0 : index
    %8 = vector.load %arg1[%c0_15, %c0_16] : memref<2x128xf32, #tpu.memory_space<vmem>>, vector<2x128xf32>
    %cst = arith.constant dense<0.000000e+00> : vector<128x128xf32>
    %9 = tpu.matmul %0, %8, %cst {dimension_numbers = #tpu.dot_dimension_numbers<[1], [0], [0], [1], [0, 0, 1, 1], [], []>} : vector<128x2xf32>, vector<2x128xf32>, vector<128x128xf32> -> vector<128x128xf32>
    %10 = vector.broadcast %1 : vector<128x1xf32> to vector<128x128xf32>
    %11 = arith.addf %9, %10 : vector<128x128xf32>
    %cst_17 = arith.constant 0.000000e+00 : f32
    %12 = vector.broadcast %cst_17 : f32 to vector<128x128xf32>
    %13 = arith.maximumf %11, %12 : vector<128x128xf32>
    %cst_18 = arith.constant dense<0.000000e+00> : vector<32x128xf32>
    %14 = tpu.matmul %2, %13, %cst_18 {dimension_numbers = #tpu.dot_dimension_numbers<[1], [0], [0], [1], [0, 0, 1, 1], [], []>} : vector<32x128xf32>, vector<128x128xf32>, vector<32x128xf32> -> vector<32x128xf32>
    %15 = vector.broadcast %3 : vector<32x1xf32> to vector<32x128xf32>
    %16 = arith.addf %14, %15 : vector<32x128xf32>
    %cst_19 = arith.constant 0.000000e+00 : f32
    %17 = vector.broadcast %cst_19 : f32 to vector<32x128xf32>
    %18 = arith.maximumf %16, %17 : vector<32x128xf32>
    %cst_20 = arith.constant dense<0.000000e+00> : vector<8x128xf32>
    %19 = tpu.matmul %4, %18, %cst_20 {dimension_numbers = #tpu.dot_dimension_numbers<[1], [0], [0], [1], [0, 0, 1, 1], [], []>} : vector<8x32xf32>, vector<32x128xf32>, vector<8x128xf32> -> vector<8x128xf32>
    %20 = vector.broadcast %5 : vector<8x1xf32> to vector<8x128xf32>
    %21 = arith.addf %19, %20 : vector<8x128xf32>
    %cst_21 = arith.constant 0.000000e+00 : f32
    %22 = vector.broadcast %cst_21 : f32 to vector<8x128xf32>
    %23 = arith.maximumf %21, %22 : vector<8x128xf32>
    %24 = vector.broadcast %6 : vector<8x1xf32> to vector<8x128xf32>
    %25 = arith.mulf %24, %23 : vector<8x128xf32>
    %cst_22 = arith.constant dense<0.000000e+00> : vector<128xf32>
    %26 = vector.multi_reduction <add>, %25, %cst_22 [0] : vector<8x128xf32> to vector<128xf32>
    %27 = vector.shape_cast %26 : vector<128xf32> to vector<1x128xf32>
    %28 = vector.broadcast %7 : vector<1x1xf32> to vector<1x128xf32>
    %29 = arith.addf %27, %28 : vector<1x128xf32>
    %c0_23 = arith.constant 0 : index
    %c0_24 = arith.constant 0 : index
    %30 = vector.load %arg10[%c0_23, %c0_24] : memref<1x128xf32, #tpu.memory_space<vmem>>, vector<1x128xf32>
    tpu.vector_store %arg10[%c0_23, %c0_24], %29 {strides = array<i32>} : memref<1x128xf32, #tpu.memory_space<vmem>>, vector<1x128xf32>,
    return
  }
  func.func @transform_0(%arg0: i32) -> (i32, i32) {
    %c0_i32 = arith.constant 0 : i32
    %c0_i32_0 = arith.constant 0 : i32
    return %c0_i32, %arg0 : i32, i32
  }
  func.func @transform_1(%arg0: i32) -> (i32, i32) {
    %c0_i32 = arith.constant 0 : i32
    %c0_i32_0 = arith.constant 0 : i32
    %c0_i32_1 = arith.constant 0 : i32
    return %c0_i32, %c0_i32_0 : i32, i32
  }
  func.func @transform_2(%arg0: i32) -> (i32, i32) {
    %c0_i32 = arith.constant 0 : i32
    %c0_i32_0 = arith.constant 0 : i32
    %c0_i32_1 = arith.constant 0 : i32
    return %c0_i32, %c0_i32_0 : i32, i32
  }
  func.func @transform_3(%arg0: i32) -> (i32, i32) {
    %c0_i32 = arith.constant 0 : i32
    %c0_i32_0 = arith.constant 0 : i32
    %c0_i32_1 = arith.constant 0 : i32
    return %c0_i32, %c0_i32_0 : i32, i32
  }
  func.func @transform_4(%arg0: i32) -> (i32, i32) {
    %c0_i32 = arith.constant 0 : i32
    %c0_i32_0 = arith.constant 0 : i32
    %c0_i32_1 = arith.constant 0 : i32
    return %c0_i32, %c0_i32_0 : i32, i32
  }
  func.func @transform_5(%arg0: i32) -> (i32, i32) {
    %c0_i32 = arith.constant 0 : i32
    %c0_i32_0 = arith.constant 0 : i32
    %c0_i32_1 = arith.constant 0 : i32
    return %c0_i32, %c0_i32_0 : i32, i32
  }
  func.func @transform_6(%arg0: i32) -> (i32, i32) {
    %c0_i32 = arith.constant 0 : i32
    %c0_i32_0 = arith.constant 0 : i32
    %c0_i32_1 = arith.constant 0 : i32
    return %c0_i32, %c0_i32_0 : i32, i32
  }
  func.func @transform_7(%arg0: i32) -> (i32, i32) {
    %c0_i32 = arith.constant 0 : i32
    %c0_i32_0 = arith.constant 0 : i32
    %c0_i32_1 = arith.constant 0 : i32
    return %c0_i32, %c0_i32_0 : i32, i32
  }
  func.func @transform_8(%arg0: i32) -> (i32, i32) {
    %c0_i32 = arith.constant 0 : i32
    %c0_i32_0 = arith.constant 0 : i32
    %c0_i32_1 = arith.constant 0 : i32
    return %c0_i32, %c0_i32_0 : i32, i32
  }
  func.func @transform_9(%arg0: i32) -> (i32, i32) {
    %c0_i32 = arith.constant 0 : i32
    %c0_i32_0 = arith.constant 0 : i32
    return %c0_i32, %arg0 : i32, i32
  }
}

</mosaic_0001>

<bundles_post_ra>
// kernel: net_simple_forward.1
= control target key start
LH: loop header
LB: loop body
LE: loop exit
PB: predicated region body
PF: predicated region fallthrough
CT: control target
= control target key end

     0   :  { %vm208_vm0 = vcmask 1041408   ;;  %vm159_vm1 = vcmask 15360   ;;  %v768_v3 = vmov 0   ;;  %vm770_vm2 = vmmov 0   ;;  %s976_s0 = inlined_call_operand.vmem [shape: f32[2,128], index: 0, kind: input, shape index: {}]   ;;  %s977_s1 = inlined_call_operand.vmem [shape: f32[128,2], index: 1, kind: input, shape index: {}]   ;;  %s978_s8 = inlined_call_operand.<no memory space> [shape: f32[1,1], index: 8, kind: input, shape index: {}]   ;;  %s979_s2 = inlined_call_operand.vmem [shape: f32[128,1], index: 2, kind: input, shape index: {}]   ;;  %s980_s4 = inlined_call_operand.vmem [shape: f32[32,1], index: 4, kind: input, shape index: {}]   ;;  %s981_s6 = inlined_call_operand.vmem [shape: f32[8,1], index: 6, kind: input, shape index: {}]   ;;  %s982_s7 = inlined_call_operand.vmem [shape: f32[8,1], index: 7, kind: input, shape index: {}]   ;;  %s983_s3 = inlined_call_operand.vmem [shape: f32[32,128], index: 3, kind: input, shape index: {}]   ;;  %s984_s5 = inlined_call_operand.vmem [shape: f32[8,32], index: 5, kind: input, shape index: {}]   ;;  %s985_s9 = inlined_call_operand.vmem [shape: f32[1,128], index: 9, kind: output, shape index: {}]  }
   0x1   :  { %v78_v0 = vld [vmem:[%s976_s0] sm:$0x3]  ;;  %v35_v2 = vld [vmem:[%s977_s1 + $0x8] sm:$0xff]  ;;  %766 = vset.pattern.permute.xlu0 %v768_v3  ;;  %767 = vset.pattern.permute.xlu1 %v768_v3  ;;  %v14_v4 = vstv %s978_s8  ;;  %v36_v5 = vld [vmem:[%s977_s1 + $0x10] sm:$0xff]  ;;  %vm487_vm3 = vcmask 261120  }
   0x2   :  { %v34_v1 = vld [vmem:[%s977_s1] sm:$0xff]  ;;  %649 = vmatprep.subr.msk.mxu0 %vm208_vm0, %v78_v0  ;;  %15 = vst [vmem:[#allocation2] sm:$0x1] %v14_v4  ;;  %v37_v6 = vld [vmem:[%s977_s1 + $0x18] sm:$0xff]  ;;  %v52_v9 = vld [vmem:[%s979_s2 + $0x10] sm:$0xff] }
   0x3   :  { %651 = vmatprep.mubr.msk.f32.mxu0 %vm159_vm1, %v34_v1  ;;  %650 = vmatpush3.msk.msra.mxu0 %vm208_vm0, %v78_v0  ;;  %v38_v7 = vld [vmem:[%s977_s1 + $0x20] sm:$0xff]  ;;  %v51_v10 = vld [vmem:[%s979_s2 + $0x8] sm:$0xff]  ;;  %v53_v12 = vld [vmem:[%s979_s2 + $0x18] sm:$0xff] }
   0x4   :  { %652 = vmatmul.mubr.msk.f32.vlgmr.msra.gmra.mrb[0].mxu0 %vm159_vm1, %v35_v2  ;;  %v50_v8 = vld [vmem:[%s979_s2] sm:$0xff]  ;;  %91 = vperm.xlu1 %767, %v52_v9   ;;  %v39_v11 = vld [vmem:[%s977_s1 + $0x28] sm:$0xff]  ;;  %v40_v13 = vld [vmem:[%s977_s1 + $0x30] sm:$0xff] }
   0x5   :  { %654 = vmatprep.mubr.msk.f32.mxu0 %vm159_vm1, %v36_v5  ;;  %81 = vperm.xlu0 %766, %v50_v8   ;;  %v54_v14 = vld [vmem:[%s979_s2 + $0x20] sm:$0xff]  ;;  %v41_v15 = vld [vmem:[%s977_s1 + $0x38] sm:$0xff]  ;;  %v55_v16 = vld [vmem:[%s979_s2 + $0x28] sm:$0xff] }
   0x6   :  { %v42_v17 = vld [vmem:[%s977_s1 + $0x40] sm:$0xff]  ;;  %v56_v18 = vld [vmem:[%s979_s2 + $0x30] sm:$0xff]  ;;  %v43_v19 = vld [vmem:[%s977_s1 + $0x48] sm:$0xff] }
   0x7   :  { %v57_v20 = vld [vmem:[%s979_s2 + $0x38] sm:$0xff]  ;;  %v44_v21 = vld [vmem:[%s977_s1 + $0x50] sm:$0xff]  ;;  %v58_v22 = vld [vmem:[%s979_s2 + $0x40] sm:$0xff] }
   0x8   :  { %655 = vmatmul.mubr.msk.f32.gmra.mrb[2].mxu0 %vm159_vm1, %v37_v6  ;;  %96 = vperm.xlu1 %767, %v53_v12   ;;  %v45_v23 = vld [vmem:[%s977_s1 + $0x58] sm:$0xff]  ;;  %v59_v24 = vld [vmem:[%s979_s2 + $0x48] sm:$0xff]  ;;  %v46_v25 = vld [vmem:[%s977_s1 + $0x60] sm:$0xff] }
   0x9   :  { %657 = vmatprep.mubr.msk.f32.mxu0 %vm159_vm1, %v38_v7  ;;  %86 = vperm.xlu0 %766, %v51_v10   ;;  %v60_v26 = vld [vmem:[%s979_s2 + $0x50] sm:$0xff]  ;;  %v47_v27 = vld [vmem:[%s977_s1 + $0x68] sm:$0xff]  ;;  %v61_v28 = vld [vmem:[%s979_s2 + $0x58] sm:$0xff] }
   0xa   :  { %v48_v29 = vld [vmem:[%s977_s1 + $0x70] sm:$0xff]  ;;  %v62_v30 = vld [vmem:[%s979_s2 + $0x60] sm:$0xff]  ;;  %v49_v31 = vld [vmem:[%s977_s1 + $0x78] sm:$0xff] }
   0xb   :  { %v63_v32 = vld [vmem:[%s979_s2 + $0x68] sm:$0xff]  ;;  %v64_v33 = vld [vmem:[%s979_s2 + $0x70] sm:$0xff]  ;;  %v65_v34 = vld [vmem:[%s979_s2 + $0x78] sm:$0xff] }
   0xc   :  { %658 = vmatmul.mubr.msk.f32.gmra.mrb[4].mxu0 %vm159_vm1, %v39_v11  ;;  %106 = vperm.xlu1 %767, %v55_v16   ;;  %v70_v35 = vld [vmem:[%s980_s4] sm:$0xff]  ;;  %v71_v36 = vld [vmem:[%s980_s4 + $0x8] sm:$0xff]  ;;  %v72_v37 = vld [vmem:[%s980_s4 + $0x10] sm:$0xff] }
   0xd   :  { %660 = vmatprep.mubr.msk.f32.mxu0 %vm159_vm1, %v40_v13  ;;  %101 = vperm.xlu0 %766, %v54_v14   ;;  %v73_v38 = vld [vmem:[%s980_s4 + $0x18] sm:$0xff]  ;;  %v75_v39 = vld [vmem:[%s981_s6] sm:$0xff] }
   0xe   :  { %v76_v40 = vld [vmem:[%s982_s7] sm:$0xff] }
   0xf   :  { %v77_v41 = vld [vmem:[#allocation2] sm:$0x1] }
  0x10   :  { %661 = vmatmul.mubr.msk.f32.gmra.mrb[6].mxu0 %vm159_vm1, %v41_v15  ;;  %116 = vperm.xlu1 %767, %v57_v20   ;;  %v66_v42 = vld [vmem:[%s983_s3] sm:$0xff] }
  0x11   :  { %663 = vmatprep.mubr.msk.f32.mxu0 %vm159_vm1, %v42_v17  ;;  %111 = vperm.xlu0 %766, %v56_v18  }
  0x12   :  { %707 = vmatprep.mubr.f32.mxu1 %v66_v42 }
  0x14   :  { %664 = vmatmul.mubr.msk.f32.gmra.mrb[8].mxu0 %vm159_vm1, %v43_v19  ;;  %126 = vperm.xlu1 %767, %v59_v24  }
  0x15   :  { %666 = vmatprep.mubr.msk.f32.mxu0 %vm159_vm1, %v44_v21  ;;  %121 = vperm.xlu0 %766, %v58_v22  }
  0x18   :  { %667 = vmatmul.mubr.msk.f32.gmra.mrb[10].mxu0 %vm159_vm1, %v45_v23  ;;  %136 = vperm.xlu1 %767, %v61_v28  }
  0x19   :  { %669 = vmatprep.mubr.msk.f32.mxu0 %vm159_vm1, %v46_v25  ;;  %131 = vperm.xlu0 %766, %v60_v26  }
  0x1c   :  { %670 = vmatmul.mubr.msk.f32.gmra.mrb[12].mxu0 %vm159_vm1, %v47_v27  ;;  %146 = vperm.xlu1 %767, %v63_v32  }
  0x1d   :  { %672 = vmatprep.mubr.msk.f32.mxu0 %vm159_vm1, %v48_v29  ;;  %141 = vperm.xlu0 %766, %v62_v30  }
  0x20   :  { %673 = vmatmul.mubr.msk.f32.gmra.mrb[14].mxu0 %vm159_vm1, %v49_v31  ;;  %156 = vperm.xlu1 %767, %v65_v34  }
  0x21   :  { %151 = vperm.xlu0 %766, %v64_v33  }
  0x24   :  { %380 = vperm.xlu1 %767, %v71_v36  }
  0x25   :  { %375 = vperm.xlu0 %766, %v70_v35  }
  0x28   :  { %390 = vperm.xlu1 %767, %v73_v38  }
  0x29   :  { %385 = vperm.xlu0 %766, %v72_v37  }
  0x2c   :  { %564 = vperm.xlu1 %767, %v76_v40  }
  0x2d   :  { %484 = vperm.xlu0 %766, %v75_v39  }
  0x31   :  { %576 = vperm.xlu0 %766, %v77_v41  }
  0x83   :  { %v92_v43 = vpop.permute.xlu1 %91 }
  0x84   :  { %v82_v44 = vpop.permute.xlu0 %81 }
  0x87   :  { %v97_v45 = vpop.permute.xlu1 %96 }
  0x88   :  { %v87_v46 = vpop.permute.xlu0 %86 }
  0x8b   :  { %v107_v47 = vpop.permute.xlu1 %106 }
  0x8c   :  { %v102_v48 = vpop.permute.xlu0 %101 }
  0x8f   :  { %v117_v54 = vpop.permute.xlu1 %116 }
  0x90   :  { %v112_v57 = vpop.permute.xlu0 %111 }
  0x93   :  { %v127_v3 = vpop.permute.xlu1 %126 }
  0x94   :  { %v122_v6 = vpop.permute.xlu0 %121 }
  0x97   :  { %v137_v15 = vpop.permute.xlu1 %136 }
  0x98   :  { %v132_v18 = vpop.permute.xlu0 %131 }
  0x9b   :  { %v147_v28 = vpop.permute.xlu1 %146 }
  0x9c   :  { %v142_v31 = vpop.permute.xlu0 %141 }
  0x9f   :  { %v157_v40 = vpop.permute.xlu1 %156 }
  0xd7   :  { %v653_v49 = vpop.f32.mrb[0].mxu0 }
  0xd8   :  { %v284_v50 = vadd.f32 %v653_v49, %v87_v46  ;;  %v278_v51 = vpop.f32.mrb[1].mxu0 }
  0xd9   :  { %v279_v52 = vadd.f32 %v278_v51, %v82_v44  ;;  %v67_v51 = vld [vmem:[%s983_s3 + $0x8] sm:$0xff] }
  0xda   :  { %v358_v53 = vmax.f32 %v284_v50, 0.0 }
  0xdb   :  { %v357_v55 = vmax.f32 %v279_v52, 0.0  ;;  %v656_v56 = vpop.f32.mrb[2].mxu0  ;;  %v68_v52 = vld [vmem:[%s983_s3 + $0x10] sm:$0xff] }
  0xdc   :  { %v294_v58 = vadd.f32 %v656_v56, %v97_v45  ;;  %v288_v59 = vpop.f32.mrb[3].mxu0  ;;  %v381_v56 = vpop.permute.xlu1 %380 }
  0xdd   :  { %v289_v60 = vadd.f32 %v288_v59, %v92_v43  ;;  %v724_v61 = vpack.c.bf16 %v358_v53, %v357_v55  ;;  %v152_v43 = vpop.permute.xlu0 %151  ;;  %v69_v53 = vld [vmem:[%s983_s3 + $0x18] sm:$0xff]  ;;  %v771_v55 = vmov 0.0  }
  0xde   :  { %v360_v62 = vmax.f32 %v294_v58, 0.0  ;;  %721 = vmatprep.mubr.msk.f32.mxu0 %vm770_vm2, %v771_v55 }
  0xdf   :  { %v359_v63 = vmax.f32 %v289_v60, 0.0  ;;  %v659_v0 = vpop.f32.mrb[4].mxu0  ;;  %725 = vmatprep.subr.bf16.mxu1 %v724_v61 }
  0xe0   :  { %v304_v1 = vadd.f32 %v659_v0, %v107_v47  ;;  %v298_v2 = vpop.f32.mrb[5].mxu0  ;;  %727 = vmatpush3.bf16.msra.mxu1 %v724_v61 }
  0xe1   :  { %v728_v4 = vpack.c.bf16 %v360_v62, %v359_v63  ;;  %v299_v5 = vadd.f32 %v298_v2, %v102_v48  ;;  %v391_v63 = vpop.permute.xlu1 %390 }
  0xe2   :  { %v362_v7 = vmax.f32 %v304_v1, 0.0 }
  0xe3   :  { %v361_v8 = vmax.f32 %v299_v5, 0.0  ;;  %v662_v9 = vpop.f32.mrb[6].mxu0  ;;  %729 = vmatprep.subr.bf16.mxu1 %v728_v4 }
  0xe4   :  { %v314_v10 = vadd.f32 %v662_v9, %v117_v54  ;;  %v308_v11 = vpop.f32.mrb[7].mxu0  ;;  %731 = vmatpush3.bf16.msra.mxu1 %v728_v4  ;;  %v769_v54 = vmov 0.0|0.0  }
  0xe5   :  { %v732_v12 = vpack.c.bf16 %v362_v7, %v361_v8  ;;  %v309_v13 = vadd.f32 %v308_v11, %v112_v57  ;;  %756 = vmatprep.subr.bf16.mxu0 %v769_v54  ;;  %v376_v57 = vpop.permute.xlu0 %375 }
  0xe6   :  { %v364_v14 = vmax.f32 %v314_v10, 0.0  ;;  %v74_v10 = vld [vmem:[%s984_s5] sm:$0xff] }
  0xe7   :  { %v363_v16 = vmax.f32 %v309_v13, 0.0  ;;  %v665_v17 = vpop.f32.mrb[8].mxu0  ;;  %733 = vmatprep.subr.bf16.mxu1 %v732_v12 }
  0xe8   :  { %v324_v19 = vadd.f32 %v665_v17, %v127_v3  ;;  %v318_v20 = vpop.f32.mrb[9].mxu0  ;;  %735 = vmatpush3.bf16.msra.mxu1 %v732_v12  ;;  %v579_v17 = vlaneseq }
  0xe9   :  { %v736_v21 = vpack.c.bf16 %v364_v14, %v363_v16  ;;  %v319_v22 = vadd.f32 %v318_v20, %v122_v6  ;;  %v386_v2 = vpop.permute.xlu0 %385  ;;  %v565_v16 = vpop.permute.xlu1 %564 }
  0xea   :  { %v366_v23 = vmax.f32 %v324_v19, 0.0  ;;  %v580_v20 = vshrl.u32 %v579_v17, 7 }
  0xeb   :  { %v365_v24 = vmax.f32 %v319_v22, 0.0  ;;  %v668_v25 = vpop.f32.mrb[10].mxu0  ;;  %737 = vmatprep.subr.bf16.mxu1 %v736_v21 }
  0xec   :  { %v334_v26 = vadd.f32 %v668_v25, %v137_v15  ;;  %v328_v27 = vpop.f32.mrb[11].mxu0  ;;  %739 = vmatpush3.bf16.msra.mxu1 %v736_v21 }
  0xed   :  { %v740_v29 = vpack.c.bf16 %v366_v23, %v365_v24  ;;  %v329_v30 = vadd.f32 %v328_v27, %v132_v18  ;;  %v485_v11 = vpop.permute.xlu0 %484  ;;  %v581_v23 = vsub.s32 0, %v580_v20 }
  0xee   :  { %v368_v32 = vmax.f32 %v334_v26, 0.0 }
  0xef   :  { %v367_v33 = vmax.f32 %v329_v30, 0.0  ;;  %v671_v34 = vpop.f32.mrb[12].mxu0  ;;  %741 = vmatprep.subr.bf16.mxu1 %v740_v29 }
  0xf0   :  { %v344_v35 = vadd.f32 %v671_v34, %v147_v28  ;;  %v338_v36 = vpop.f32.mrb[13].mxu0  ;;  %743 = vmatpush3.bf16.msra.mxu1 %v740_v29 }
  0xf1   :  { %v744_v37 = vpack.c.bf16 %v368_v32, %v367_v33  ;;  %v339_v38 = vadd.f32 %v338_v36, %v142_v31  ;;  %v577_v25 = vpop.permute.xlu0 %576 }
  0xf2   :  { %v370_v39 = vmax.f32 %v344_v35, 0.0  ;;  %v582_v27 = vrot.slane %v577_v25, %v581_v23 }
  0xf3   :  { %v369_v41 = vmax.f32 %v339_v38, 0.0  ;;  %v674_v42 = vpop.f32.mrb[14].mxu0  ;;  %745 = vmatprep.subr.bf16.mxu1 %v744_v37 }
  0xf4   :  { %v354_v44 = vadd.f32 %v674_v42, %v157_v40  ;;  %v348_v45 = vpop.f32.mrb[15].mxu0  ;;  %747 = vmatpush3.bf16.msra.mxu1 %v744_v37 }
  0xf5   :  { %v748_v46 = vpack.c.bf16 %v370_v39, %v369_v41  ;;  %v349_v47 = vadd.f32 %v348_v45, %v152_v43 }
  0xf6   :  { %v372_v48 = vmax.f32 %v354_v44, 0.0 }
  0xf7   :  { %v371_v49 = vmax.f32 %v349_v47, 0.0  ;;  %749 = vmatprep.subr.bf16.mxu1 %v748_v46 }
  0xf8   :  { %751 = vmatpush3.bf16.msra.mxu1 %v748_v46 }
  0xf9   :  { %v752_v50 = vpack.c.bf16 %v372_v48, %v371_v49 }
  0xfb   :  { %753 = vmatprep.subr.bf16.mxu1 %v752_v50 }
  0xfc   :  { %755 = vmatpush3.bf16.msra.mxu1 %v752_v50 }
  0xff   :  { %708 = vmatmul.mubr.f32.vlgmr.msra.gmra.mrb[0].mxu1 %v67_v51 }
 0x100   :  { %710 = vmatprep.mubr.f32.mxu1 %v68_v52 }
 0x103   :  { %711 = vmatmul.mubr.f32.gmra.mrb[2].mxu1 %v69_v53 }
 0x1d2   :  { %v709_v58 = vpop.f32.mrb[0].mxu1 }
 0x1d3   :  { %v465_v59 = vadd.f32 %v709_v58, %v381_v56  ;;  %v459_v60 = vpop.f32.mrb[1].mxu1 }
 0x1d4   :  { %v460_v61 = vadd.f32 %v459_v60, %v376_v57 }
 0x1d5   :  { %v479_v62 = vmax.f32 %v465_v59, 0.0 }
 0x1d6   :  { %v478_v0 = vmax.f32 %v460_v61, 0.0  ;;  %v712_v1 = vpop.f32.mrb[2].mxu1 }
 0x1d7   :  { %v475_v3 = vadd.f32 %v712_v1, %v391_v63  ;;  %v469_v4 = vpop.f32.mrb[3].mxu1 }
 0x1d8   :  { %v757_v5 = vpack.c.bf16 %v479_v62, %v478_v0  ;;  %v470_v6 = vadd.f32 %v469_v4, %v386_v2 }
 0x1d9   :  { %v481_v7 = vmax.f32 %v475_v3, 0.0 }
 0x1da   :  { %v480_v8 = vmax.f32 %v470_v6, 0.0  ;;  %758 = vmatpush3.bf16.msra.mxu0 %v757_v5 }
 0x1db   :  { %759 = vmatprep.subr.bf16.mxu0 %v769_v54 }
 0x1dc   :  { %v760_v9 = vpack.c.bf16 %v481_v7, %v480_v8 }
 0x1de   :  { %761 = vmatpush3.bf16.msra.mxu0 %v760_v9 }
 0x1e1   :  { %722 = vmatmul.mubr.msk.f32.vlgmr.msra.gmra.mrb[16].mxu0 %vm487_vm3, %v74_v10 }
 0x2b4   :  { %v557_v12 = vpop.f32.mrb[16].mxu0 }
 0x2b5   :  { %v558_v13 = vadd.f32 %v557_v12, %v485_v11  ;;  %v723_v14 = vpop.f32.mrb[17].mxu0 }
 0x2b7   :  { %v561_v15 = vmax.f32 %v558_v13, 0.0 }
 0x2b9   :  { %v567_v18 = vmul.f32 %v565_v16, %v561_v15 }
 0x2bb   :  { %v568_v19 = vrot.slane %v567_v18, 4 }
 0x2bd   :  { %v569_v21 = vadd.f32 %v568_v19, %v567_v18 }
 0x2bf   :  { %v570_v22 = vrot.slane %v569_v21, 2 }
 0x2c1   :  { %v571_v24 = vadd.f32 %v570_v22, %v569_v21 }
 0x2c3   :  { %v572_v26 = vrot.slane %v571_v24, 1 }
 0x2c5   :  { %v573_v28 = vadd.f32 %v572_v26, %v571_v24 }
 0x2c7   :  { %v583_v29 = vadd.f32 %v582_v27, %v573_v28 }
 0x2c9   :  { %584 = vst [vmem:[%s985_s9] sm:$0x1] %v583_v29 }

</bundles_post_ra>
